<compile_context>
chip_gen: v5e
topology: v5e:2x2
jax: 0.10.0
libtpu: 0.0.40
codegen_flags: <defaults>
</compile_context>

<pallas_src>
import functools

import jax
import jax.numpy as jnp
from jax.experimental import pallas as pl
from jax.experimental.pallas import tpu as pltpu


def _gcn_agg_kernel(dinv_ref, a_ref, xw_ref, b_ref, o_ref, acc_ref, *, apply_relu):
    """One GCN layer's aggregation:  o = dinv * (A_hat @ xw_scaled) + b [, ReLU].

    dinv_ref: [tm, 1]  f32   D^{-1/2} for this row tile (destination nodes)
    a_ref   : [tm, tk] bf16  A_hat tile (rows = destinations, cols = sources)
    xw_ref  : [tk, H]  bf16  (D^{-1/2} X W) rows for this k tile (source nodes)
    b_ref   : [1, H]   f32   bias
    o_ref   : [tm, H]  f32   output row tile
    acc_ref : [tm, H]  f32   VMEM accumulator (persists across the k axis)
    """
    k = pl.program_id(1)

    @pl.when(k == 0)
    def _():
        acc_ref[...] = jnp.zeros_like(acc_ref)

    acc_ref[...] += jnp.dot(a_ref[...], xw_ref[...],
                            preferred_element_type=jnp.float32)

    @pl.when(k == pl.num_programs(1) - 1)
    def _():
        out = dinv_ref[...] * acc_ref[...] + b_ref[...]
        if apply_relu:
            out = jnp.maximum(out, 0.0)
        o_ref[...] = out.astype(o_ref.dtype)


def _pick_tile(n_pad, pref):
    """Largest multiple of 128 that divides n_pad and is <= pref."""
    t = min(pref, n_pad)
    while n_pad % t != 0:
        t -= 128
    return t


def _gcn_aggregate(a_bf16, xw_scaled, dinv, bias, *, apply_relu, tm, tk):
    """Tiled Pallas call for  dinv * (A_hat @ xw_scaled) + bias  [+ ReLU]."""
    n_pad = a_bf16.shape[0]
    h = xw_scaled.shape[1]
    grid = (n_pad // tm, n_pad // tk)

    flops = 2 * n_pad * n_pad * h
    bytes_accessed = (a_bf16.size * a_bf16.dtype.itemsize
                      + grid[0] * xw_scaled.size * xw_scaled.dtype.itemsize
                      + n_pad * h * 4 + n_pad * 4 + h * 4)

    return pl.pallas_call(
        functools.partial(_gcn_agg_kernel, apply_relu=apply_relu),
        out_shape=jax.ShapeDtypeStruct((n_pad, h), jnp.float32),
        grid_spec=pltpu.PrefetchScalarGridSpec(
            num_scalar_prefetch=0,
            grid=grid,
            in_specs=[
                pl.BlockSpec((tm, 1), lambda i, k: (i, 0)),    # dinv (dst rows)
                pl.BlockSpec((tm, tk), lambda i, k: (i, k)),   # A_hat bf16 stream
                pl.BlockSpec((tk, h), lambda i, k: (k, 0)),    # scaled XW (src rows)
                pl.BlockSpec((1, h), lambda i, k: (0, 0)),     # bias
            ],
            out_specs=pl.BlockSpec((tm, h), lambda i, k: (i, 0)),
            scratch_shapes=[pltpu.VMEM((tm, h), jnp.float32)],
        ),
        compiler_params=pltpu.CompilerParams(
            dimension_semantics=("parallel", "arbitrary"),
            vmem_limit_bytes=32 << 20,
        ),
        cost_estimate=pl.CostEstimate(flops=flops, transcendentals=0,
                                      bytes_accessed=bytes_accessed),
    )(dinv, a_bf16, xw_scaled, bias)


@jax.jit
def gcn_forward(x, edge_index, w1, b1, w2, b2):
    """x: [N, F] f32, edge_index: [2, E] int32 (row 0 = src, row 1 = dst)."""
    n, f = x.shape
    hdim = w1.shape[1]
    c = w2.shape[1]
    n_pad = ((n + 127) // 128) * 128          # lane-dense node dim / full MXU tiles
    c_pad = ((c + 127) // 128) * 128          # lane-dense output store

    # --- glue (fused under jit): dense A_hat with add_remaining_self_loops ---
    src, dst = edge_index[0], edge_index[1]
    a_hat = jnp.zeros((n_pad, n_pad), jnp.float32).at[dst, src].add(1.0)
    idx = jnp.arange(n)
    diag = a_hat[idx, idx]
    a_hat = a_hat.at[idx, idx].set(jnp.where(diag > 0.0, diag, 1.0))

    # gcn_norm hoisted out of the kernel (exact f32 row-sum).
    # Guard required: zero-padded rows have deg == 0 -> dinv = 0 (neutral).
    deg = jnp.sum(a_hat, axis=1, keepdims=True)
    dinv = jnp.where(deg > 0.0, jax.lax.rsqrt(deg), 0.0)

    a_bf = a_hat.astype(jnp.bfloat16)         # ship the O(N^2) operand as bf16

    # bf16 features / weights (biases stay f32); pad class dim of conv2 params.
    x_p = jnp.zeros((n_pad, f), jnp.bfloat16).at[:n].set(x.astype(jnp.bfloat16))
    w1_bf = w1.astype(jnp.bfloat16)
    w2_p = jnp.zeros((hdim, c_pad), jnp.bfloat16).at[:, :c].set(w2.astype(jnp.bfloat16))
    b1_2d = b1.reshape(1, hdim).astype(jnp.float32)
    b2_p = jnp.zeros((1, c_pad), jnp.float32).at[:, :c].set(b2.reshape(1, -1))

    # Tile sizes: 128-row tiles suit v5e's 4x128 MXU, 256 fills v6e/v7x's 2x256;
    # at the demo size (n_pad = 128) both collapse to a single 128x128 tile.
    tm = _pick_tile(n_pad, 256)
    tk = _pick_tile(n_pad, 512)

    # ---- layer 1: projection (XLA matmul) + Pallas aggregation (norm+bias+ReLU) ----
    xw1 = jnp.dot(x_p, w1_bf, preferred_element_type=jnp.float32)
    xw1_s = (dinv * xw1).astype(jnp.bfloat16)                 # fold column scale
    h = _gcn_aggregate(a_bf, xw1_s, dinv, b1_2d, apply_relu=True, tm=tm, tk=tk)

    # ---- layer 2 ----
    hw2 = jnp.dot(h.astype(jnp.bfloat16), w2_p, preferred_element_type=jnp.float32)
    hw2_s = (dinv * hw2).astype(jnp.bfloat16)
    out = _gcn_aggregate(a_bf, hw2_s, dinv, b2_p, apply_relu=False, tm=tm, tk=tk)

    return out[:n, :c]


def _glorot(key, shape):
    fan_in, fan_out = shape
    limit = jnp.sqrt(6.0 / (fan_in + fan_out))
    return jax.random.uniform(key, shape, jnp.float32, -limit, limit)


def _reference_forward(x, edge_index, w1, b1, w2, b2):
    """Pure-f32 dense reference of the PyG 2-layer GCN forward."""
    n = x.shape[0]
    a = jnp.zeros((n, n), jnp.float32).at[edge_index[1], edge_index[0]].add(1.0)
    ii = jnp.arange(n)
    d = a[ii, ii]
    a = a.at[ii, ii].set(jnp.where(d > 0.0, d, 1.0))
    dinv = jax.lax.rsqrt(jnp.sum(a, axis=1, keepdims=True))
    a_n = dinv * a * dinv.T
    h = jnp.maximum(a_n @ (x @ w1) + b1, 0.0)
    return a_n @ (h @ w2) + b2


if __name__ == "__main__":
    num_nodes = 16
    num_features = 64
    hidden = 64
    num_classes = 1

    key = jax.random.PRNGKey(0)
    k_x, k_e, k_w1, k_w2 = jax.random.split(key, 4)

    # node features
    x = jax.random.normal(k_x, (num_nodes, num_features), jnp.float32)

    # deterministic small graph: a ring plus a few extra directed edges
    ring_src = jnp.arange(num_nodes, dtype=jnp.int32)
    ring_dst = (ring_src + 1) % num_nodes
    extra_src = jax.random.randint(k_e, (16,), 0, num_nodes, dtype=jnp.int32)
    extra_dst = (extra_src + 3) % num_nodes
    edge_index = jnp.stack(
        [jnp.concatenate([ring_src, extra_src]),
         jnp.concatenate([ring_dst, extra_dst])], axis=0)  # [2, E], E=32

    # parameters (PyG GCNConv: glorot weights, zero bias)
    w1 = _glorot(k_w1, (num_features, hidden))
    b1 = jnp.zeros((hidden,), jnp.float32)
    w2 = _glorot(k_w2, (hidden, num_classes))
    b2 = jnp.zeros((num_classes,), jnp.float32)

    out = gcn_forward(x, edge_index, w1, b1, w2, b2)
    out = jax.block_until_ready(out)
    assert out.shape == (num_nodes, num_classes)
    assert bool(jnp.all(jnp.isfinite(out)))

    # loose parity check vs f32 reference (kernel path uses bf16 MXU operands)
    ref = _reference_forward(x, edge_index, w1, b1, w2, b2)
    assert bool(jnp.allclose(out, ref, rtol=5e-2, atol=5e-2)), (
        f"max abs err {float(jnp.max(jnp.abs(out - ref)))}")

    print("KERNEL_OK")
</pallas_src>

<mosaic_0001>
module attributes {stable_mosaic.version = 11 : i64} {
  func.func @_gcn_agg_kernel(%arg0: i32, %arg1: i32, %arg2: memref<128x1xf32, #tpu.memory_space<vmem>>, %arg3: memref<128x128xbf16, #tpu.memory_space<vmem>>, %arg4: memref<128x64xbf16, #tpu.memory_space<vmem>>, %arg5: memref<1x64xf32, #tpu.memory_space<vmem>>, %arg6: memref<128x64xf32, #tpu.memory_space<vmem>>, %arg7: memref<128x64xf32, #tpu.memory_space<vmem>>) attributes {dimension_semantics = [#tpu.dimension_semantics<parallel>, #tpu.dimension_semantics<arbitrary>], iteration_bounds = array<i64: 1, 1>, scalar_prefetch = 0 : i64, scratch_operands = 1 : i64, tpu.core_type = #tpu.core_type<tc>, window_params = [{transform_indices = @transform_0, window_bounds = array<i64: 128, 1>}, {transform_indices = @transform_1, window_bounds = array<i64: 128, 128>}, {transform_indices = @transform_2, window_bounds = array<i64: 128, 64>}, {pipeline_mode = #tpu.pipeline_mode<synchronous>, transform_indices = @transform_3, window_bounds = array<i64: 1, 64>}, {transform_indices = @transform_4, window_bounds = array<i64: 128, 64>}]} {
    %c0_i32 = arith.constant 0 : i32
    %0 = arith.cmpi eq, %arg1, %c0_i32 : i32
    %1 = arith.extui %0 : i1 to i32
    %c0_i32_0 = arith.constant 0 : i32
    %2 = arith.cmpi ne, %1, %c0_i32_0 : i32
    scf.if %2 {
      %cst_10 = arith.constant 0.000000e+00 : f32
      %12 = vector.broadcast %cst_10 : f32 to vector<128x64xf32>
      %c0_11 = arith.constant 0 : index
      %c0_12 = arith.constant 0 : index
      %13 = vector.load %arg7[%c0_11, %c0_12] : memref<128x64xf32, #tpu.memory_space<vmem>>, vector<128x64xf32>
      tpu.vector_store %arg7[%c0_11, %c0_12], %12 {strides = array<i32>} : memref<128x64xf32, #tpu.memory_space<vmem>>, vector<128x64xf32>,
    } else {
    }
    %c0 = arith.constant 0 : index
    %c0_1 = arith.constant 0 : index
    %3 = vector.load %arg7[%c0, %c0_1] : memref<128x64xf32, #tpu.memory_space<vmem>>, vector<128x64xf32>
    %c0_2 = arith.constant 0 : index
    %c0_3 = arith.constant 0 : index
    %4 = vector.load %arg3[%c0_2, %c0_3] : memref<128x128xbf16, #tpu.memory_space<vmem>>, vector<128x128xbf16>
    %c0_4 = arith.constant 0 : index
    %c0_5 = arith.constant 0 : index
    %5 = vector.load %arg4[%c0_4, %c0_5] : memref<128x64xbf16, #tpu.memory_space<vmem>>, vector<128x64xbf16>
    %cst = arith.constant dense<0.000000e+00> : vector<128x64xf32>
    %6 = tpu.matmul %4, %5, %cst {dimension_numbers = #tpu.dot_dimension_numbers<[1], [0], [0], [1], [0, 0, 1, 1], [], []>} : vector<128x128xbf16>, vector<128x64xbf16>, vector<128x64xf32> -> vector<128x64xf32>
    %7 = arith.addf %3, %6 : vector<128x64xf32>
    %c0_6 = arith.constant 0 : index
    %c0_7 = arith.constant 0 : index
    %8 = vector.load %arg7[%c0_6, %c0_7] : memref<128x64xf32, #tpu.memory_space<vmem>>, vector<128x64xf32>
    tpu.vector_store %arg7[%c0_6, %c0_7], %7 {strides = array<i32>} : memref<128x64xf32, #tpu.memory_space<vmem>>, vector<128x64xf32>,
    %c0_i32_8 = arith.constant 0 : i32
    %9 = arith.cmpi eq, %arg1, %c0_i32_8 : i32
    %10 = arith.extui %9 : i1 to i32
    %c0_i32_9 = arith.constant 0 : i32
    %11 = arith.cmpi ne, %10, %c0_i32_9 : i32
    scf.if %11 {
      %c0_10 = arith.constant 0 : index
      %c0_11 = arith.constant 0 : index
      %12 = vector.load %arg2[%c0_10, %c0_11] : memref<128x1xf32, #tpu.memory_space<vmem>>, vector<128x1xf32>
      %c0_12 = arith.constant 0 : index
      %c0_13 = arith.constant 0 : index
      %13 = vector.load %arg7[%c0_12, %c0_13] : memref<128x64xf32, #tpu.memory_space<vmem>>, vector<128x64xf32>
      %14 = vector.broadcast %12 : vector<128x1xf32> to vector<128x64xf32>
      %15 = arith.mulf %14, %13 : vector<128x64xf32>
      %c0_14 = arith.constant 0 : index
      %c0_15 = arith.constant 0 : index
      %16 = vector.load %arg5[%c0_14, %c0_15] : memref<1x64xf32, #tpu.memory_space<vmem>>, vector<1x64xf32>
      %17 = vector.broadcast %16 : vector<1x64xf32> to vector<128x64xf32>
      %18 = arith.addf %15, %17 : vector<128x64xf32>
      %cst_16 = arith.constant 0.000000e+00 : f32
      %19 = vector.broadcast %cst_16 : f32 to vector<128x64xf32>
      %20 = arith.maximumf %18, %19 : vector<128x64xf32>
      %c0_17 = arith.constant 0 : index
      %c0_18 = arith.constant 0 : index
      %21 = vector.load %arg6[%c0_17, %c0_18] : memref<128x64xf32, #tpu.memory_space<vmem>>, vector<128x64xf32>
      tpu.vector_store %arg6[%c0_17, %c0_18], %20 {strides = array<i32>} : memref<128x64xf32, #tpu.memory_space<vmem>>, vector<128x64xf32>,
    } else {
    }
    return
  }
  func.func @transform_0(%arg0: i32, %arg1: i32) -> (i32, i32) {
    %c0_i32 = arith.constant 0 : i32
    %c0_i32_0 = arith.constant 0 : i32
    return %arg0, %c0_i32 : i32, i32
  }
  func.func @transform_1(%arg0: i32, %arg1: i32) -> (i32, i32) {
    %c0_i32 = arith.constant 0 : i32
    return %arg0, %arg1 : i32, i32
  }
  func.func @transform_2(%arg0: i32, %arg1: i32) -> (i32, i32) {
    %c0_i32 = arith.constant 0 : i32
    %c0_i32_0 = arith.constant 0 : i32
    return %arg1, %c0_i32 : i32, i32
  }
  func.func @transform_3(%arg0: i32, %arg1: i32) -> (i32, i32) {
    %c0_i32 = arith.constant 0 : i32
    %c0_i32_0 = arith.constant 0 : i32
    %c0_i32_1 = arith.constant 0 : i32
    return %c0_i32, %c0_i32_0 : i32, i32
  }
  func.func @transform_4(%arg0: i32, %arg1: i32) -> (i32, i32) {
    %c0_i32 = arith.constant 0 : i32
    %c0_i32_0 = arith.constant 0 : i32
    return %arg0, %c0_i32 : i32, i32
  }
}

module attributes {stable_mosaic.version = 11 : i64} {
  func.func @_gcn_agg_kernel(%arg0: i32, %arg1: i32, %arg2: memref<128x1xf32, #tpu.memory_space<vmem>>, %arg3: memref<128x128xbf16, #tpu.memory_space<vmem>>, %arg4: memref<128x128xbf16, #tpu.memory_space<vmem>>, %arg5: memref<1x128xf32, #tpu.memory_space<vmem>>, %arg6: memref<128x128xf32, #tpu.memory_space<vmem>>, %arg7: memref<128x128xf32, #tpu.memory_space<vmem>>) attributes {dimension_semantics = [#tpu.dimension_semantics<parallel>, #tpu.dimension_semantics<arbitrary>], iteration_bounds = array<i64: 1, 1>, scalar_prefetch = 0 : i64, scratch_operands = 1 : i64, tpu.core_type = #tpu.core_type<tc>, window_params = [{transform_indices = @transform_0, window_bounds = array<i64: 128, 1>}, {transform_indices = @transform_1, window_bounds = array<i64: 128, 128>}, {transform_indices = @transform_2, window_bounds = array<i64: 128, 128>}, {pipeline_mode = #tpu.pipeline_mode<synchronous>, transform_indices = @transform_3, window_bounds = array<i64: 1, 128>}, {transform_indices = @transform_4, window_bounds = array<i64: 128, 128>}]} {
    %c0_i32 = arith.constant 0 : i32
    %0 = arith.cmpi eq, %arg1, %c0_i32 : i32
    %1 = arith.extui %0 : i1 to i32
    %c0_i32_0 = arith.constant 0 : i32
    %2 = arith.cmpi ne, %1, %c0_i32_0 : i32
    scf.if %2 {
      %cst_10 = arith.constant 0.000000e+00 : f32
      %12 = vector.broadcast %cst_10 : f32 to vector<128x128xf32>
      %c0_11 = arith.constant 0 : index
      %c0_12 = arith.constant 0 : index
      %13 = vector.load %arg7[%c0_11, %c0_12] : memref<128x128xf32, #tpu.memory_space<vmem>>, vector<128x128xf32>
      tpu.vector_store %arg7[%c0_11, %c0_12], %12 {strides = array<i32>} : memref<128x128xf32, #tpu.memory_space<vmem>>, vector<128x128xf32>,
    } else {
    }
    %c0 = arith.constant 0 : index
    %c0_1 = arith.constant 0 : index
    %3 = vector.load %arg7[%c0, %c0_1] : memref<128x128xf32, #tpu.memory_space<vmem>>, vector<128x128xf32>
    %c0_2 = arith.constant 0 : index
    %c0_3 = arith.constant 0 : index
    %4 = vector.load %arg3[%c0_2, %c0_3] : memref<128x128xbf16, #tpu.memory_space<vmem>>, vector<128x128xbf16>
    %c0_4 = arith.constant 0 : index
    %c0_5 = arith.constant 0 : index
    %5 = vector.load %arg4[%c0_4, %c0_5] : memref<128x128xbf16, #tpu.memory_space<vmem>>, vector<128x128xbf16>
    %cst = arith.constant dense<0.000000e+00> : vector<128x128xf32>
    %6 = tpu.matmul %4, %5, %cst {dimension_numbers = #tpu.dot_dimension_numbers<[1], [0], [0], [1], [0, 0, 1, 1], [], []>} : vector<128x128xbf16>, vector<128x128xbf16>, vector<128x128xf32> -> vector<128x128xf32>
    %7 = arith.addf %3, %6 : vector<128x128xf32>
    %c0_6 = arith.constant 0 : index
    %c0_7 = arith.constant 0 : index
    %8 = vector.load %arg7[%c0_6, %c0_7] : memref<128x128xf32, #tpu.memory_space<vmem>>, vector<128x128xf32>
    tpu.vector_store %arg7[%c0_6, %c0_7], %7 {strides = array<i32>} : memref<128x128xf32, #tpu.memory_space<vmem>>, vector<128x128xf32>,
    %c0_i32_8 = arith.constant 0 : i32
    %9 = arith.cmpi eq, %arg1, %c0_i32_8 : i32
    %10 = arith.extui %9 : i1 to i32
    %c0_i32_9 = arith.constant 0 : i32
    %11 = arith.cmpi ne, %10, %c0_i32_9 : i32
    scf.if %11 {
      %c0_10 = arith.constant 0 : index
      %c0_11 = arith.constant 0 : index
      %12 = vector.load %arg2[%c0_10, %c0_11] : memref<128x1xf32, #tpu.memory_space<vmem>>, vector<128x1xf32>
      %c0_12 = arith.constant 0 : index
      %c0_13 = arith.constant 0 : index
      %13 = vector.load %arg7[%c0_12, %c0_13] : memref<128x128xf32, #tpu.memory_space<vmem>>, vector<128x128xf32>
      %14 = vector.broadcast %12 : vector<128x1xf32> to vector<128x128xf32>
      %15 = arith.mulf %14, %13 : vector<128x128xf32>
      %c0_14 = arith.constant 0 : index
      %c0_15 = arith.constant 0 : index
      %16 = vector.load %arg5[%c0_14, %c0_15] : memref<1x128xf32, #tpu.memory_space<vmem>>, vector<1x128xf32>
      %17 = vector.broadcast %16 : vector<1x128xf32> to vector<128x128xf32>
      %18 = arith.addf %15, %17 : vector<128x128xf32>
      %c0_16 = arith.constant 0 : index
      %c0_17 = arith.constant 0 : index
      %19 = vector.load %arg6[%c0_16, %c0_17] : memref<128x128xf32, #tpu.memory_space<vmem>>, vector<128x128xf32>
      tpu.vector_store %arg6[%c0_16, %c0_17], %18 {strides = array<i32>} : memref<128x128xf32, #tpu.memory_space<vmem>>, vector<128x128xf32>,
    } else {
    }
    return
  }
  func.func @transform_0(%arg0: i32, %arg1: i32) -> (i32, i32) {
    %c0_i32 = arith.constant 0 : i32
    %c0_i32_0 = arith.constant 0 : i32
    return %arg0, %c0_i32 : i32, i32
  }
  func.func @transform_1(%arg0: i32, %arg1: i32) -> (i32, i32) {
    %c0_i32 = arith.constant 0 : i32
    return %arg0, %arg1 : i32, i32
  }
  func.func @transform_2(%arg0: i32, %arg1: i32) -> (i32, i32) {
    %c0_i32 = arith.constant 0 : i32
    %c0_i32_0 = arith.constant 0 : i32
    return %arg1, %c0_i32 : i32, i32
  }
  func.func @transform_3(%arg0: i32, %arg1: i32) -> (i32, i32) {
    %c0_i32 = arith.constant 0 : i32
    %c0_i32_0 = arith.constant 0 : i32
    %c0_i32_1 = arith.constant 0 : i32
    return %c0_i32, %c0_i32_0 : i32, i32
  }
  func.func @transform_4(%arg0: i32, %arg1: i32) -> (i32, i32) {
    %c0_i32 = arith.constant 0 : i32
    %c0_i32_0 = arith.constant 0 : i32
    return %arg0, %c0_i32 : i32, i32
  }
}

</mosaic_0001>

<bundles_post_ra>
// kernel: gcn_forward.2
= control target key start
LH: loop header
LB: loop body
LE: loop exit
PB: predicated region body
PF: predicated region fallthrough
CT: control target
= control target key end

     0   :  { %v561_v1 = vmov 0   ;;  %vm21_vm0 = vcmask 523264   ;;  %v562_v33 = vmov 0.0   ;;  %s822_s2 = inlined_call_operand.vmem [shape: bf16[128,64], index: 2, kind: input, shape index: {}]   ;;  %s823_s0 = inlined_call_operand.vmem [shape: f32[128,1], index: 0, kind: input, shape index: {}]   ;;  %s824_s3 = inlined_call_operand.vmem [shape: f32[1,64], index: 3, kind: input, shape index: {}]   ;;  %s825_s1 = inlined_call_operand.vmem [shape: bf16[128,128], index: 1, kind: input, shape index: {}]   ;;  %s826_s4 = inlined_call_operand.vmem [shape: f32[128,64], index: 4, kind: output, shape index: {}]  }
   0x1   :  { %v530_v0 = vld [vmem:[%s822_s2 + $0x38] sm:$0xff]  ;;  %557 = vset.pattern.permute.xlu0 %v561_v1  ;;  %v267_v2 = vld [vmem:[%s823_s0] sm:$0xff]  ;;  %558 = vset.pattern.permute.xlu1 %v561_v1  ;;  %v529_v3 = vld [vmem:[%s822_s2 + $0x30] sm:$0xff]  ;;  %22 = vst.msk [vmem:[#allocation2] sm:$0xff] %vm21_vm0, %v562_v33 }
   0x2   :  { %301 = vperm.xlu0 %557, %v267_v2   ;;  %559 = vset.pattern.permute.xlu2 %v561_v1  ;;  %v269_v4 = vld [vmem:[%s823_s0 + $0x10] sm:$0xff]  ;;  %v528_v5 = vld [vmem:[%s822_s2 + $0x28] sm:$0xff]  ;;  %v271_v7 = vld [vmem:[%s823_s0 + $0x20] sm:$0xff]  ;;  %23 = vst.msk [vmem:[#allocation2 + $0x8] sm:$0xff] %vm21_vm0, %v562_v33 }
   0x3   :  { %182 = vmatpush.bf16.msra.mxu0 %v530_v0  ;;  %531 = vmatpush.bf16.msra.mxu1 %v530_v0  ;;  %v268_v6 = vld [vmem:[%s823_s0 + $0x8] sm:$0xff]  ;;  %v270_v8 = vld [vmem:[%s823_s0 + $0x18] sm:$0xff]  ;;  %v527_v9 = vld [vmem:[%s822_s2 + $0x20] sm:$0xff]  ;;  %24 = vst.msk [vmem:[#allocation2 + $0x10] sm:$0xff] %vm21_vm0, %v562_v33 }
   0x4   :  { %532 = vmatpush.bf16.msra.mxu2 %v530_v0  ;;  %533 = vmatpush.bf16.msra.mxu3 %v530_v0  ;;  %v526_v10 = vld [vmem:[%s822_s2 + $0x18] sm:$0xff]  ;;  %v273_v11 = vld [vmem:[%s823_s0 + $0x30] sm:$0xff]  ;;  %v272_v14 = vld [vmem:[%s823_s0 + $0x28] sm:$0xff]  ;;  %25 = vst.msk [vmem:[#allocation2 + $0x18] sm:$0xff] %vm21_vm0, %v562_v33 }
   0x5   :  { %311 = vperm.xlu1 %558, %v269_v4   ;;  %321 = vperm.xlu2 %559, %v271_v7   ;;  %v274_v12 = vld [vmem:[%s823_s0 + $0x38] sm:$0xff]  ;;  %v525_v13 = vld [vmem:[%s822_s2 + $0x10] sm:$0xff]  ;;  %v524_v15 = vld [vmem:[%s822_s2 + $0x8] sm:$0xff]  ;;  %26 = vst.msk [vmem:[#allocation2 + $0x20] sm:$0xff] %vm21_vm0, %v562_v33 }
   0x6   :  { %v276_v16 = vld [vmem:[%s823_s0 + $0x48] sm:$0xff]  ;;  %v277_v17 = vld [vmem:[%s823_s0 + $0x50] sm:$0xff]  ;;  %v275_v18 = vld [vmem:[%s823_s0 + $0x40] sm:$0xff]  ;;  %27 = vst.msk [vmem:[#allocation2 + $0x28] sm:$0xff] %vm21_vm0, %v562_v33 }
   0x7   :  { %183 = vmatpush.bf16.msra.mxu0 %v529_v3  ;;  %534 = vmatpush.bf16.msra.mxu1 %v529_v3  ;;  %v523_v19 = vld [vmem:[%s822_s2] sm:$0xff]  ;;  %v517_v21 = vld [vmem:[%s825_s1 + $0x10] sm:$0xff]  ;;  %v280_v25 = vld [vmem:[%s823_s0 + $0x68] sm:$0xff]  ;;  %28 = vst.msk [vmem:[#allocation2 + $0x30] sm:$0xff] %vm21_vm0, %v562_v33 }
   0x8   :  { %535 = vmatpush.bf16.msra.mxu2 %v529_v3  ;;  %536 = vmatpush.bf16.msra.mxu3 %v529_v3  ;;  %v515_v20 = vld [vmem:[%s825_s1] sm:$0xff]  ;;  %v521_v23 = vld [vmem:[%s825_s1 + $0x30] sm:$0xff]  ;;  %v278_v26 = vld [vmem:[%s823_s0 + $0x58] sm:$0xff]  ;;  %29 = vst.msk [vmem:[#allocation2 + $0x38] sm:$0xff] %vm21_vm0, %v562_v33 }
   0x9   :  { %v519_v22 = vld [vmem:[%s825_s1 + $0x20] sm:$0xff]  ;;  %v282_v27 = vld [vmem:[%s823_s0 + $0x78] sm:$0xff]  ;;  %v281_v28 = vld [vmem:[%s823_s0 + $0x70] sm:$0xff]  ;;  %30 = vst.msk [vmem:[#allocation2 + $0x40] sm:$0xff] %vm21_vm0, %v562_v33 }
   0xa   :  { %306 = vperm.xlu0 %557, %v268_v6   ;;  %v279_v24 = vld [vmem:[%s823_s0 + $0x60] sm:$0xff]  ;;  %v516_v29 = vld [vmem:[%s825_s1 + $0x8] sm:$0xff]  ;;  %v518_v30 = vld [vmem:[%s825_s1 + $0x18] sm:$0xff]  ;;  %31 = vst.msk [vmem:[#allocation2 + $0x48] sm:$0xff] %vm21_vm0, %v562_v33 }
   0xb   :  { %184 = vmatpush.bf16.msra.mxu0 %v528_v5  ;;  %537 = vmatpush.bf16.msra.mxu1 %v528_v5  ;;  %v520_v31 = vld [vmem:[%s825_s1 + $0x28] sm:$0xff]  ;;  %v522_v32 = vld [vmem:[%s825_s1 + $0x38] sm:$0xff]  ;;  %32 = vst.msk [vmem:[#allocation2 + $0x50] sm:$0xff] %vm21_vm0, %v562_v33  ;;  %v38_v40 = vld [vmem:[#allocation2] sm:$0xff] }
   0xc   :  { %538 = vmatpush.bf16.msra.mxu2 %v528_v5  ;;  %539 = vmatpush.bf16.msra.mxu3 %v528_v5  ;;  %33 = vst.msk [vmem:[#allocation2 + $0x58] sm:$0xff] %vm21_vm0, %v562_v33  ;;  %v42_v41 = vld [vmem:[#allocation2 + $0x20] sm:$0xff]  ;;  %v39_v51 = vld [vmem:[#allocation2 + $0x8] sm:$0xff]  ;;  %v40_v7 = vld [vmem:[#allocation2 + $0x10] sm:$0xff] }
   0xd   :  { %316 = vperm.xlu1 %558, %v270_v8   ;;  %326 = vperm.xlu2 %559, %v272_v14   ;;  %34 = vst.msk [vmem:[#allocation2 + $0x60] sm:$0xff] %vm21_vm0, %v562_v33  ;;  %v43_v52 = vld [vmem:[#allocation2 + $0x28] sm:$0xff]  ;;  %v717_v59 = vld [vmem:[%s824_s3] ss:$0 sm:$0xff] }
   0xe   :  { %35 = vst.msk [vmem:[#allocation2 + $0x68] sm:$0xff] %vm21_vm0, %v562_v33 }
   0xf   :  { %185 = vmatpush.bf16.msra.mxu0 %v527_v9  ;;  %540 = vmatpush.bf16.msra.mxu1 %v527_v9  ;;  %36 = vst.msk [vmem:[#allocation2 + $0x70] sm:$0xff] %vm21_vm0, %v562_v33 }
  0x10   :  { %541 = vmatpush.bf16.msra.mxu2 %v527_v9  ;;  %542 = vmatpush.bf16.msra.mxu3 %v527_v9  ;;  %37 = vst.msk [vmem:[#allocation2 + $0x78] sm:$0xff] %vm21_vm0, %v562_v33  ;;  %v46_v47 = vld [vmem:[#allocation2 + $0x40] sm:$0xff] }
  0x11   :  { %v47_v3 = vld [vmem:[#allocation2 + $0x48] sm:$0xff] }
  0x12   :  { %331 = vperm.xlu0 %557, %v273_v11   ;;  %v44_v11 = vld [vmem:[#allocation2 + $0x30] sm:$0xff] }
  0x13   :  { %186 = vmatpush.bf16.msra.mxu0 %v526_v10  ;;  %543 = vmatpush.bf16.msra.mxu1 %v526_v10 }
  0x14   :  { %544 = vmatpush.bf16.msra.mxu2 %v526_v10  ;;  %545 = vmatpush.bf16.msra.mxu3 %v526_v10  ;;  %v50_v48 = vld [vmem:[#allocation2 + $0x60] sm:$0xff] }
  0x15   :  { %336 = vperm.xlu1 %558, %v274_v12   ;;  %341 = vperm.xlu2 %559, %v275_v18   ;;  %v51_v4 = vld [vmem:[#allocation2 + $0x68] sm:$0xff] }
  0x17   :  { %187 = vmatpush.bf16.msra.mxu0 %v525_v13  ;;  %546 = vmatpush.bf16.msra.mxu1 %v525_v13 }
  0x18   :  { %547 = vmatpush.bf16.msra.mxu2 %v525_v13  ;;  %548 = vmatpush.bf16.msra.mxu3 %v525_v13 }
  0x1a   :  { %346 = vperm.xlu0 %557, %v276_v16  }
  0x1b   :  { %188 = vmatpush.bf16.msra.mxu0 %v524_v15  ;;  %549 = vmatpush.bf16.msra.mxu1 %v524_v15 }
  0x1c   :  { %550 = vmatpush.bf16.msra.mxu2 %v524_v15  ;;  %551 = vmatpush.bf16.msra.mxu3 %v524_v15 }
  0x1d   :  { %351 = vperm.xlu1 %558, %v277_v17   ;;  %356 = vperm.xlu2 %559, %v278_v26  }
  0x1f   :  { %189 = vmatpush.bf16.msra.mxu0 %v523_v19  ;;  %552 = vmatpush.bf16.msra.mxu1 %v523_v19 }
  0x20   :  { %553 = vmatpush.bf16.msra.mxu2 %v523_v19  ;;  %554 = vmatpush.bf16.msra.mxu3 %v523_v19 }
  0x22   :  { %190 = vmatmul.bf16.vlgmr.msra.gmra.mxu0 %v515_v20  ;;  %200 = vmatmul.bf16.vlgmr.msra.gmra.mxu1 %v517_v21 }
  0x23   :  { %210 = vmatmul.bf16.vlgmr.msra.gmra.mxu2 %v519_v22  ;;  %220 = vmatmul.bf16.vlgmr.msra.gmra.mxu3 %v521_v23 }
  0x24   :  { %361 = vperm.xlu0 %557, %v279_v24  }
  0x25   :  { %366 = vperm.xlu1 %558, %v280_v25   ;;  %371 = vperm.xlu2 %559, %v281_v28  }
  0x2c   :  { %376 = vperm.xlu0 %557, %v282_v27  }
  0x32   :  { %195 = vmatmul.bf16.gmra.mxu0 %v516_v29  ;;  %205 = vmatmul.bf16.gmra.mxu1 %v518_v30 }
  0x33   :  { %215 = vmatmul.bf16.gmra.mxu2 %v520_v31  ;;  %225 = vmatmul.bf16.gmra.mxu3 %v522_v32  ;;  %v48_v31 = vld [vmem:[#allocation2 + $0x50] sm:$0xff] }
  0x5f   :  { %v322_v37 = vpop.permute.xlu2 %321 }
  0x67   :  { %v327_v46 = vpop.permute.xlu2 %326 }
  0x6f   :  { %v342_v5 = vpop.permute.xlu2 %341 }
  0x74   :  { %v302_v34 = vpop.permute.xlu0 %301 }
  0x77   :  { %v702_v36 = vpop.permute.xlu1 %311 }
  0x7c   :  { %v700_v35 = vpop.permute.xlu0 %306 }
  0x7f   :  { %v706_v39 = vpop.permute.xlu1 %316 }
  0x84   :  { %v704_v38 = vpop.permute.xlu0 %331 }
  0x87   :  { %v712_v50 = vpop.permute.xlu1 %336 }
  0x8c   :  { %v710_v49 = vpop.permute.xlu0 %346 }
  0x8f   :  { %v729_v17 = vpop.permute.xlu1 %351 }
  0x96   :  { %v362_v20 = vpop.permute.xlu0 %361 }
  0x9f   :  { %v191_v42 = vpop.f32.mrf.mxu0  ;;  %v201_v43 = vpop.f32.mrf.mxu1 }
  0xa0   :  { %v231_v44 = vadd.f32 %v191_v42, %v38_v40  ;;  %v235_v45 = vadd.f32 %v201_v43, %v42_v41  ;;  %v41_v42 = vld [vmem:[#allocation2 + $0x18] sm:$0xff] }
  0xa2   :  { %248 = vst.msk [vmem:[#allocation2] sm:$0xff] %vm21_vm0, %v231_v44 }
  0xa3   :  { %252 = vst.msk [vmem:[#allocation2 + $0x20] sm:$0xff] %vm21_vm0, %v235_v45 }
  0xa6   :  { %v211_v53 = vpop.f32.mrf.mxu2  ;;  %v221_v54 = vpop.f32.mrf.mxu3 }
  0xa7   :  { %v239_v55 = vadd.f32 %v211_v53, %v46_v47  ;;  %v243_v56 = vadd.f32 %v221_v54, %v50_v48  ;;  %v193_v57 = vpop.f32.mrf.mxu0  ;;  %v203_v58 = vpop.f32.mrf.mxu1 }
  0xa8   :  { %v232_v60 = vadd.f32 %v193_v57, %v39_v51  ;;  %v236_v61 = vadd.f32 %v203_v58, %v43_v52  ;;  %v357_v52 = vpop.permute.xlu2 %356 }
  0xa9   :  { %v283_v62 = vld [vmem:[#allocation2] sm:$0xff]  ;;  %256 = vst.msk [vmem:[#allocation2 + $0x40] sm:$0xff] %vm21_vm0, %v239_v55  ;;  %v367_v55 = vpop.permute.xlu1 %366 }
  0xaa   :  { %v379_v63 = vmul.f32 %v302_v34, %v283_v62  ;;  %v287_v0 = vld [vmem:[#allocation2 + $0x20] sm:$0xff]  ;;  %260 = vst.msk [vmem:[#allocation2 + $0x60] sm:$0xff] %vm21_vm0, %v243_v56  ;;  %v52_v34 = vld [vmem:[#allocation2 + $0x70] sm:$0xff] }
  0xab   :  { %v383_v1 = vmul.f32 %v322_v37, %v287_v0  ;;  %249 = vst.msk [vmem:[#allocation2 + $0x8] sm:$0xff] %vm21_vm0, %v232_v60 }
  0xac   :  { %v399_v2 = vadd.f32 %v717_v59, %v379_v63  ;;  %253 = vst.msk [vmem:[#allocation2 + $0x28] sm:$0xff] %vm21_vm0, %v236_v61 }
  0xad   :  { %v403_v6 = vadd.f32 %v717_v59, %v383_v1 }
  0xae   :  { %v415_v8 = vmax.f32 %v399_v2, 0.0  ;;  %v213_v9 = vpop.f32.mrf.mxu2  ;;  %v223_v10 = vpop.f32.mrf.mxu3 }
  0xaf   :  { %v419_v12 = vmax.f32 %v403_v6, 0.0  ;;  %v240_v13 = vadd.f32 %v213_v9, %v47_v3  ;;  %v244_v14 = vadd.f32 %v223_v10, %v51_v4  ;;  %v196_v15 = vpop.f32.mrf.mxu0  ;;  %v206_v16 = vpop.f32.mrf.mxu1  ;;  %v53_v6 = vld [vmem:[#allocation2 + $0x78] sm:$0xff] }
  0xb0   :  { %431 = vst.msk [vmem:[%s826_s4] sm:$0xff] %vm21_vm0, %v415_v8  ;;  %v291_v18 = vld [vmem:[#allocation2 + $0x40] sm:$0xff]  ;;  %v233_v19 = vadd.f32 %v196_v15, %v40_v7  ;;  %v237_v23 = vadd.f32 %v206_v16, %v44_v11 }
  0xb1   :  { %435 = vst.msk [vmem:[%s826_s4 + $0x20] sm:$0xff] %vm21_vm0, %v419_v12  ;;  %v387_v21 = vmul.f32 %v342_v5, %v291_v18  ;;  %v295_v22 = vld [vmem:[#allocation2 + $0x60] sm:$0xff] }
  0xb2   :  { %v391_v24 = vmul.f32 %v362_v20, %v295_v22  ;;  %v284_v25 = vld [vmem:[#allocation2 + $0x8] sm:$0xff]  ;;  %257 = vst.msk [vmem:[#allocation2 + $0x48] sm:$0xff] %vm21_vm0, %v240_v13  ;;  %v372_v13 = vpop.permute.xlu2 %371 }
  0xb3   :  { %v407_v26 = vadd.f32 %v717_v59, %v387_v21  ;;  %v380_v27 = vmul.f32 %v700_v35, %v284_v25  ;;  %v288_v28 = vld [vmem:[#allocation2 + $0x28] sm:$0xff]  ;;  %261 = vst.msk [vmem:[#allocation2 + $0x68] sm:$0xff] %vm21_vm0, %v244_v14 }
  0xb4   :  { %v411_v29 = vadd.f32 %v717_v59, %v391_v24  ;;  %v384_v30 = vmul.f32 %v327_v46, %v288_v28  ;;  %250 = vst.msk [vmem:[#allocation2 + $0x10] sm:$0xff] %vm21_vm0, %v233_v19  ;;  %v45_v46 = vld [vmem:[#allocation2 + $0x38] sm:$0xff]  ;;  %v377_v28 = vpop.permute.xlu0 %376 }
  0xb5   :  { %v423_v32 = vmax.f32 %v407_v26, 0.0  ;;  %v400_v33 = vadd.f32 %v717_v59, %v380_v27  ;;  %254 = vst.msk [vmem:[#allocation2 + $0x30] sm:$0xff] %vm21_vm0, %v237_v23 }
  0xb6   :  { %v427_v37 = vmax.f32 %v411_v29, 0.0  ;;  %v404_v40 = vadd.f32 %v717_v59, %v384_v30  ;;  %v216_v41 = vpop.f32.mrf.mxu2  ;;  %v226_v35 = vpop.f32.mrf.mxu3 }
  0xb7   :  { %439 = vst.msk [vmem:[%s826_s4 + $0x40] sm:$0xff] %vm21_vm0, %v423_v32  ;;  %v416_v43 = vmax.f32 %v400_v33, 0.0  ;;  %v241_v44 = vadd.f32 %v216_v41, %v48_v31  ;;  %v198_v45 = vpop.f32.mrf.mxu0  ;;  %v208_v47 = vpop.f32.mrf.mxu1  ;;  %v245_v51 = vadd.f32 %v226_v35, %v52_v34 }
  0xb8   :  { %443 = vst.msk [vmem:[%s826_s4 + $0x60] sm:$0xff] %vm21_vm0, %v427_v37  ;;  %v420_v48 = vmax.f32 %v404_v40, 0.0  ;;  %v234_v54 = vadd.f32 %v198_v45, %v41_v42  ;;  %v238_v58 = vadd.f32 %v208_v47, %v45_v46 }
  0xb9   :  { %432 = vst.msk [vmem:[%s826_s4 + $0x8] sm:$0xff] %vm21_vm0, %v416_v43  ;;  %v292_v53 = vld [vmem:[#allocation2 + $0x48] sm:$0xff] }
  0xba   :  { %436 = vst.msk [vmem:[%s826_s4 + $0x28] sm:$0xff] %vm21_vm0, %v420_v48  ;;  %v388_v56 = vmul.f32 %v710_v49, %v292_v53  ;;  %v296_v57 = vld [vmem:[#allocation2 + $0x68] sm:$0xff]  ;;  %v49_v49 = vld [vmem:[#allocation2 + $0x58] sm:$0xff] }
  0xbb   :  { %v392_v60 = vmul.f32 %v367_v55, %v296_v57  ;;  %v285_v61 = vld [vmem:[#allocation2 + $0x10] sm:$0xff]  ;;  %258 = vst.msk [vmem:[#allocation2 + $0x50] sm:$0xff] %vm21_vm0, %v241_v44 }
  0xbc   :  { %v408_v62 = vadd.f32 %v717_v59, %v388_v56  ;;  %v381_v63 = vmul.f32 %v702_v36, %v285_v61  ;;  %v289_v0 = vld [vmem:[#allocation2 + $0x30] sm:$0xff]  ;;  %262 = vst.msk [vmem:[#allocation2 + $0x70] sm:$0xff] %vm21_vm0, %v245_v51 }
  0xbd   :  { %v412_v1 = vadd.f32 %v717_v59, %v392_v60  ;;  %v385_v2 = vmul.f32 %v704_v38, %v289_v0  ;;  %251 = vst.msk [vmem:[#allocation2 + $0x18] sm:$0xff] %vm21_vm0, %v234_v54 }
  0xbe   :  { %v424_v3 = vmax.f32 %v408_v62, 0.0  ;;  %v401_v4 = vadd.f32 %v717_v59, %v381_v63  ;;  %255 = vst.msk [vmem:[#allocation2 + $0x38] sm:$0xff] %vm21_vm0, %v238_v58  ;;  %v218_v5 = vpop.f32.mrf.mxu2  ;;  %v228_v7 = vpop.f32.mrf.mxu3 }
  0xbf   :  { %v428_v8 = vmax.f32 %v412_v1, 0.0  ;;  %v405_v36 = vadd.f32 %v717_v59, %v385_v2  ;;  %v242_v9 = vadd.f32 %v218_v5, %v49_v49  ;;  %v246_v11 = vadd.f32 %v228_v7, %v53_v6 }
  0xc0   :  { %440 = vst.msk [vmem:[%s826_s4 + $0x48] sm:$0xff] %vm21_vm0, %v424_v3  ;;  %v417_v38 = vmax.f32 %v401_v4, 0.0 }
  0xc1   :  { %444 = vst.msk [vmem:[%s826_s4 + $0x68] sm:$0xff] %vm21_vm0, %v428_v8  ;;  %v421_v10 = vmax.f32 %v405_v36, 0.0 }
  0xc2   :  { %433 = vst.msk [vmem:[%s826_s4 + $0x10] sm:$0xff] %vm21_vm0, %v417_v38  ;;  %v293_v12 = vld [vmem:[#allocation2 + $0x50] sm:$0xff] }
  0xc3   :  { %437 = vst.msk [vmem:[%s826_s4 + $0x30] sm:$0xff] %vm21_vm0, %v421_v10  ;;  %v389_v14 = vmul.f32 %v729_v17, %v293_v12  ;;  %v297_v15 = vld [vmem:[#allocation2 + $0x70] sm:$0xff] }
  0xc4   :  { %v393_v16 = vmul.f32 %v372_v13, %v297_v15  ;;  %v286_v18 = vld [vmem:[#allocation2 + $0x18] sm:$0xff]  ;;  %259 = vst.msk [vmem:[#allocation2 + $0x58] sm:$0xff] %vm21_vm0, %v242_v9 }
  0xc5   :  { %v409_v19 = vadd.f32 %v717_v59, %v389_v14  ;;  %v382_v20 = vmul.f32 %v706_v39, %v286_v18  ;;  %v290_v21 = vld [vmem:[#allocation2 + $0x38] sm:$0xff]  ;;  %263 = vst.msk [vmem:[#allocation2 + $0x78] sm:$0xff] %vm21_vm0, %v246_v11 }
  0xc6   :  { %v413_v22 = vadd.f32 %v717_v59, %v393_v16  ;;  %v386_v23 = vmul.f32 %v712_v50, %v290_v21 }
  0xc7   :  { %v425_v24 = vmax.f32 %v409_v19, 0.0  ;;  %v402_v25 = vadd.f32 %v717_v59, %v382_v20 }
  0xc8   :  { %v429_v17 = vmax.f32 %v413_v22, 0.0  ;;  %v406_v26 = vadd.f32 %v717_v59, %v386_v23 }
  0xc9   :  { %441 = vst.msk [vmem:[%s826_s4 + $0x50] sm:$0xff] %vm21_vm0, %v425_v24  ;;  %v418_v27 = vmax.f32 %v402_v25, 0.0 }
  0xca   :  { %445 = vst.msk [vmem:[%s826_s4 + $0x70] sm:$0xff] %vm21_vm0, %v429_v17  ;;  %v422_v39 = vmax.f32 %v406_v26, 0.0 }
  0xcb   :  { %434 = vst.msk [vmem:[%s826_s4 + $0x18] sm:$0xff] %vm21_vm0, %v418_v27  ;;  %v294_v50 = vld [vmem:[#allocation2 + $0x58] sm:$0xff] }
  0xcc   :  { %438 = vst.msk [vmem:[%s826_s4 + $0x38] sm:$0xff] %vm21_vm0, %v422_v39  ;;  %v390_v29 = vmul.f32 %v357_v52, %v294_v50  ;;  %v298_v30 = vld [vmem:[#allocation2 + $0x78] sm:$0xff] }
  0xcd   :  { %v394_v31 = vmul.f32 %v377_v28, %v298_v30 }
  0xce   :  { %v410_v32 = vadd.f32 %v717_v59, %v390_v29 }
  0xcf   :  { %v414_v33 = vadd.f32 %v717_v59, %v394_v31 }
  0xd0   :  { %v426_v34 = vmax.f32 %v410_v32, 0.0 }
  0xd1   :  { %v430_v37 = vmax.f32 %v414_v33, 0.0 }
  0xd2   :  { %442 = vst.msk [vmem:[%s826_s4 + $0x58] sm:$0xff] %vm21_vm0, %v426_v34 }
  0xd3   :  { %446 = vst.msk [vmem:[%s826_s4 + $0x78] sm:$0xff] %vm21_vm0, %v430_v37 }

// kernel: gcn_forward.3
= control target key start
LH: loop header
LB: loop body
LE: loop exit
PB: predicated region body
PF: predicated region fallthrough
CT: control target
= control target key end

     0   :  { %v542_v0 = vmov 0   ;;  %s733_s0 = inlined_call_operand.vmem [shape: f32[128,1], index: 0, kind: input, shape index: {}]   ;;  %s734_s2 = inlined_call_operand.vmem [shape: bf16[128,128], index: 2, kind: input, shape index: {}]   ;;  %s735_s1 = inlined_call_operand.vmem [shape: bf16[128,128], index: 1, kind: input, shape index: {}]   ;;  %s736_s3 = inlined_call_operand.vmem [shape: f32[1,128], index: 3, kind: input, shape index: {}]   ;;  %s737_s4 = inlined_call_operand.vmem [shape: f32[128,128], index: 4, kind: output, shape index: {}]  }
   0x1   :  { %538 = vset.pattern.permute.xlu0 %v542_v0  ;;  %v265_v1 = vld [vmem:[%s733_s0] sm:$0xff]  ;;  %v512_v2 = vld [vmem:[%s734_s2 + $0x38] sm:$0xff]  ;;  %539 = vset.pattern.permute.xlu1 %v542_v0  ;;  %v267_v3 = vld [vmem:[%s733_s0 + $0x10] sm:$0xff] }
   0x2   :  { %299 = vperm.xlu0 %538, %v265_v1   ;;  %540 = vset.pattern.permute.xlu2 %v542_v0  ;;  %v511_v4 = vld [vmem:[%s734_s2 + $0x30] sm:$0xff]  ;;  %v266_v5 = vld [vmem:[%s733_s0 + $0x8] sm:$0xff]  ;;  %v269_v7 = vld [vmem:[%s733_s0 + $0x20] sm:$0xff] }
   0x3   :  { %181 = vmatpush.bf16.msra.mxu0 %v512_v2  ;;  %513 = vmatpush.bf16.msra.mxu1 %v512_v2  ;;  %v510_v6 = vld [vmem:[%s734_s2 + $0x28] sm:$0xff]  ;;  %v268_v8 = vld [vmem:[%s733_s0 + $0x18] sm:$0xff]  ;;  %v509_v9 = vld [vmem:[%s734_s2 + $0x20] sm:$0xff] }
   0x4   :  { %514 = vmatpush.bf16.msra.mxu2 %v512_v2  ;;  %515 = vmatpush.bf16.msra.mxu3 %v512_v2  ;;  %v270_v10 = vld [vmem:[%s733_s0 + $0x28] sm:$0xff]  ;;  %v271_v11 = vld [vmem:[%s733_s0 + $0x30] sm:$0xff]  ;;  %v508_v12 = vld [vmem:[%s734_s2 + $0x18] sm:$0xff] }
   0x5   :  { %309 = vperm.xlu1 %539, %v267_v3   ;;  %319 = vperm.xlu2 %540, %v269_v7   ;;  %v272_v13 = vld [vmem:[%s733_s0 + $0x38] sm:$0xff]  ;;  %v507_v14 = vld [vmem:[%s734_s2 + $0x10] sm:$0xff]  ;;  %v273_v15 = vld [vmem:[%s733_s0 + $0x40] sm:$0xff] }
   0x6   :  { %v274_v16 = vld [vmem:[%s733_s0 + $0x48] sm:$0xff]  ;;  %v275_v18 = vld [vmem:[%s733_s0 + $0x50] sm:$0xff]  ;;  %v505_v19 = vld [vmem:[%s734_s2] sm:$0xff] }
   0x7   :  { %182 = vmatpush.bf16.msra.mxu0 %v511_v4  ;;  %516 = vmatpush.bf16.msra.mxu1 %v511_v4  ;;  %v506_v17 = vld [vmem:[%s734_s2 + $0x8] sm:$0xff]  ;;  %v497_v20 = vld [vmem:[%s735_s1] sm:$0xff]  ;;  %v276_v21 = vld [vmem:[%s733_s0 + $0x58] sm:$0xff] }
   0x8   :  { %517 = vmatpush.bf16.msra.mxu2 %v511_v4  ;;  %518 = vmatpush.bf16.msra.mxu3 %v511_v4  ;;  %v277_v22 = vld [vmem:[%s733_s0 + $0x60] sm:$0xff]  ;;  %v499_v23 = vld [vmem:[%s735_s1 + $0x10] sm:$0xff]  ;;  %v278_v26 = vld [vmem:[%s733_s0 + $0x68] sm:$0xff] }
   0x9   :  { %v501_v24 = vld [vmem:[%s735_s1 + $0x20] sm:$0xff]  ;;  %v503_v25 = vld [vmem:[%s735_s1 + $0x30] sm:$0xff]  ;;  %v280_v28 = vld [vmem:[%s733_s0 + $0x78] sm:$0xff] }
   0xa   :  { %304 = vperm.xlu0 %538, %v266_v5   ;;  %v279_v27 = vld [vmem:[%s733_s0 + $0x70] sm:$0xff]  ;;  %v498_v29 = vld [vmem:[%s735_s1 + $0x8] sm:$0xff]  ;;  %v500_v30 = vld [vmem:[%s735_s1 + $0x18] sm:$0xff] }
   0xb   :  { %183 = vmatpush.bf16.msra.mxu0 %v510_v6  ;;  %519 = vmatpush.bf16.msra.mxu1 %v510_v6  ;;  %v502_v31 = vld [vmem:[%s735_s1 + $0x28] sm:$0xff]  ;;  %v504_v32 = vld [vmem:[%s735_s1 + $0x38] sm:$0xff]  ;;  %v667_v42 = vld [vmem:[%s736_s3] ss:$0 sm:$0xff] }
   0xc   :  { %520 = vmatpush.bf16.msra.mxu2 %v510_v6  ;;  %521 = vmatpush.bf16.msra.mxu3 %v510_v6 }
   0xd   :  { %314 = vperm.xlu1 %539, %v268_v8   ;;  %324 = vperm.xlu2 %540, %v270_v10  }
   0xf   :  { %184 = vmatpush.bf16.msra.mxu0 %v509_v9  ;;  %522 = vmatpush.bf16.msra.mxu1 %v509_v9 }
  0x10   :  { %523 = vmatpush.bf16.msra.mxu2 %v509_v9  ;;  %524 = vmatpush.bf16.msra.mxu3 %v509_v9 }
  0x12   :  { %329 = vperm.xlu0 %538, %v271_v11  }
  0x13   :  { %185 = vmatpush.bf16.msra.mxu0 %v508_v12  ;;  %525 = vmatpush.bf16.msra.mxu1 %v508_v12 }
  0x14   :  { %526 = vmatpush.bf16.msra.mxu2 %v508_v12  ;;  %527 = vmatpush.bf16.msra.mxu3 %v508_v12 }
  0x15   :  { %334 = vperm.xlu1 %539, %v272_v13   ;;  %339 = vperm.xlu2 %540, %v273_v15  }
  0x17   :  { %186 = vmatpush.bf16.msra.mxu0 %v507_v14  ;;  %528 = vmatpush.bf16.msra.mxu1 %v507_v14 }
  0x18   :  { %529 = vmatpush.bf16.msra.mxu2 %v507_v14  ;;  %530 = vmatpush.bf16.msra.mxu3 %v507_v14 }
  0x1a   :  { %344 = vperm.xlu0 %538, %v274_v16  }
  0x1b   :  { %187 = vmatpush.bf16.msra.mxu0 %v506_v17  ;;  %531 = vmatpush.bf16.msra.mxu1 %v506_v17 }
  0x1c   :  { %532 = vmatpush.bf16.msra.mxu2 %v506_v17  ;;  %533 = vmatpush.bf16.msra.mxu3 %v506_v17 }
  0x1d   :  { %349 = vperm.xlu1 %539, %v275_v18   ;;  %354 = vperm.xlu2 %540, %v276_v21  }
  0x1f   :  { %188 = vmatpush.bf16.msra.mxu0 %v505_v19  ;;  %534 = vmatpush.bf16.msra.mxu1 %v505_v19 }
  0x20   :  { %535 = vmatpush.bf16.msra.mxu2 %v505_v19  ;;  %536 = vmatpush.bf16.msra.mxu3 %v505_v19 }
  0x22   :  { %359 = vperm.xlu0 %538, %v277_v22   ;;  %189 = vmatmul.bf16.vlgmr.msra.gmra.mxu0 %v497_v20 }
  0x23   :  { %199 = vmatmul.bf16.vlgmr.msra.gmra.mxu1 %v499_v23  ;;  %209 = vmatmul.bf16.vlgmr.msra.gmra.mxu2 %v501_v24 }
  0x24   :  { %219 = vmatmul.bf16.vlgmr.msra.gmra.mxu3 %v503_v25 }
  0x25   :  { %364 = vperm.xlu1 %539, %v278_v26   ;;  %369 = vperm.xlu2 %540, %v279_v27  }
  0x2a   :  { %374 = vperm.xlu0 %538, %v280_v28  }
  0x32   :  { %194 = vmatmul.bf16.gmra.mxu0 %v498_v29 }
  0x33   :  { %204 = vmatmul.bf16.gmra.mxu1 %v500_v30  ;;  %214 = vmatmul.bf16.gmra.mxu2 %v502_v31 }
  0x34   :  { %224 = vmatmul.bf16.gmra.mxu3 %v504_v32 }
  0x5f   :  { %v320_v36 = vpop.permute.xlu2 %319 }
  0x67   :  { %v325_v39 = vpop.permute.xlu2 %324 }
  0x6f   :  { %v340_v47 = vpop.permute.xlu2 %339 }
  0x74   :  { %v300_v33 = vpop.permute.xlu0 %299 }
  0x77   :  { %v310_v34 = vpop.permute.xlu1 %309  ;;  %v355_v0 = vpop.permute.xlu2 %354 }
  0x7c   :  { %v305_v35 = vpop.permute.xlu0 %304 }
  0x7f   :  { %v315_v37 = vpop.permute.xlu1 %314  ;;  %v370_v14 = vpop.permute.xlu2 %369 }
  0x84   :  { %v330_v38 = vpop.permute.xlu0 %329 }
  0x87   :  { %v335_v40 = vpop.permute.xlu1 %334 }
  0x8c   :  { %v345_v41 = vpop.permute.xlu0 %344 }
  0x8f   :  { %v350_v50 = vpop.permute.xlu1 %349 }
  0x94   :  { %v360_v51 = vpop.permute.xlu0 %359 }
  0x97   :  { %v365_v1 = vpop.permute.xlu1 %364 }
  0x9c   :  { %v375_v28 = vpop.permute.xlu0 %374 }
  0x9f   :  { %v190_v43 = vpop.f32.mrf.mxu0 }
  0xa0   :  { %v377_v44 = vmul.f32 %v300_v33, %v190_v43  ;;  %v200_v45 = vpop.f32.mrf.mxu1 }
  0xa1   :  { %v381_v46 = vmul.f32 %v320_v36, %v200_v45 }
  0xa2   :  { %v397_v48 = vadd.f32 %v667_v42, %v377_v44 }
  0xa3   :  { %v401_v49 = vadd.f32 %v667_v42, %v381_v46 }
  0xa4   :  { %413 = vst [vmem:[%s737_s4] sm:$0xff] %v397_v48 }
  0xa5   :  { %417 = vst [vmem:[%s737_s4 + $0x20] sm:$0xff] %v401_v49 }
  0xa6   :  { %v210_v52 = vpop.f32.mrf.mxu2 }
  0xa7   :  { %v385_v53 = vmul.f32 %v340_v47, %v210_v52  ;;  %v220_v54 = vpop.f32.mrf.mxu3  ;;  %v192_v55 = vpop.f32.mrf.mxu0 }
  0xa8   :  { %v389_v56 = vmul.f32 %v360_v51, %v220_v54  ;;  %v378_v57 = vmul.f32 %v305_v35, %v192_v55  ;;  %v202_v58 = vpop.f32.mrf.mxu1 }
  0xa9   :  { %v405_v59 = vadd.f32 %v667_v42, %v385_v53  ;;  %v382_v60 = vmul.f32 %v325_v39, %v202_v58 }
  0xaa   :  { %v409_v61 = vadd.f32 %v667_v42, %v389_v56  ;;  %v398_v62 = vadd.f32 %v667_v42, %v378_v57 }
  0xab   :  { %421 = vst [vmem:[%s737_s4 + $0x40] sm:$0xff] %v405_v59  ;;  %v402_v63 = vadd.f32 %v667_v42, %v382_v60 }
  0xac   :  { %425 = vst [vmem:[%s737_s4 + $0x60] sm:$0xff] %v409_v61 }
  0xad   :  { %414 = vst [vmem:[%s737_s4 + $0x8] sm:$0xff] %v398_v62 }
  0xae   :  { %418 = vst [vmem:[%s737_s4 + $0x28] sm:$0xff] %v402_v63  ;;  %v212_v2 = vpop.f32.mrf.mxu2 }
  0xaf   :  { %v386_v3 = vmul.f32 %v345_v41, %v212_v2  ;;  %v222_v4 = vpop.f32.mrf.mxu3  ;;  %v195_v5 = vpop.f32.mrf.mxu0 }
  0xb0   :  { %v390_v6 = vmul.f32 %v365_v1, %v222_v4  ;;  %v379_v7 = vmul.f32 %v310_v34, %v195_v5  ;;  %v205_v8 = vpop.f32.mrf.mxu1 }
  0xb1   :  { %v406_v9 = vadd.f32 %v667_v42, %v386_v3  ;;  %v383_v10 = vmul.f32 %v330_v38, %v205_v8 }
  0xb2   :  { %v410_v11 = vadd.f32 %v667_v42, %v390_v6  ;;  %v399_v12 = vadd.f32 %v667_v42, %v379_v7 }
  0xb3   :  { %422 = vst [vmem:[%s737_s4 + $0x48] sm:$0xff] %v406_v9  ;;  %v403_v13 = vadd.f32 %v667_v42, %v383_v10 }
  0xb4   :  { %426 = vst [vmem:[%s737_s4 + $0x68] sm:$0xff] %v410_v11 }
  0xb5   :  { %415 = vst [vmem:[%s737_s4 + $0x10] sm:$0xff] %v399_v12 }
  0xb6   :  { %419 = vst [vmem:[%s737_s4 + $0x30] sm:$0xff] %v403_v13  ;;  %v215_v15 = vpop.f32.mrf.mxu2 }
  0xb7   :  { %v387_v16 = vmul.f32 %v350_v50, %v215_v15  ;;  %v225_v17 = vpop.f32.mrf.mxu3  ;;  %v197_v18 = vpop.f32.mrf.mxu0 }
  0xb8   :  { %v391_v19 = vmul.f32 %v370_v14, %v225_v17  ;;  %v380_v20 = vmul.f32 %v315_v37, %v197_v18  ;;  %v207_v21 = vpop.f32.mrf.mxu1 }
  0xb9   :  { %v407_v22 = vadd.f32 %v667_v42, %v387_v16  ;;  %v384_v23 = vmul.f32 %v335_v40, %v207_v21 }
  0xba   :  { %v411_v24 = vadd.f32 %v667_v42, %v391_v19  ;;  %v400_v25 = vadd.f32 %v667_v42, %v380_v20 }
  0xbb   :  { %423 = vst [vmem:[%s737_s4 + $0x50] sm:$0xff] %v407_v22  ;;  %v404_v26 = vadd.f32 %v667_v42, %v384_v23 }
  0xbc   :  { %427 = vst [vmem:[%s737_s4 + $0x70] sm:$0xff] %v411_v24 }
  0xbd   :  { %416 = vst [vmem:[%s737_s4 + $0x18] sm:$0xff] %v400_v25 }
  0xbe   :  { %420 = vst [vmem:[%s737_s4 + $0x38] sm:$0xff] %v404_v26  ;;  %v217_v27 = vpop.f32.mrf.mxu2 }
  0xbf   :  { %v388_v29 = vmul.f32 %v355_v0, %v217_v27  ;;  %v227_v30 = vpop.f32.mrf.mxu3 }
  0xc0   :  { %v392_v31 = vmul.f32 %v375_v28, %v227_v30 }
  0xc1   :  { %v408_v32 = vadd.f32 %v667_v42, %v388_v29 }
  0xc2   :  { %v412_v33 = vadd.f32 %v667_v42, %v392_v31 }
  0xc3   :  { %424 = vst [vmem:[%s737_s4 + $0x58] sm:$0xff] %v408_v32 }
  0xc4   :  { %428 = vst [vmem:[%s737_s4 + $0x78] sm:$0xff] %v412_v33 }

</bundles_post_ra>
